<compile_context>
chip_gen: v7x
topology: tpu7x:2x2x1
jax: 0.10.0
libtpu: 0.0.40
codegen_flags: <defaults>
</compile_context>

<pallas_src>
import functools

import jax
import jax.numpy as jnp
from jax.experimental import pallas as pl
from jax.experimental.pallas import tpu as pltpu


def _round_up(n, m):
    return ((n + m - 1) // m) * m


def _layer_norm(x, gamma, beta, eps=1e-5):
    mean = jnp.mean(x, axis=-1, keepdims=True)
    var = jnp.mean((x - mean) ** 2, axis=-1, keepdims=True)
    return (x - mean) * jax.lax.rsqrt(var + eps) * gamma + beta


def d_net_kernel(x_ref, wdm_ref, wdi_ref, vec_ref, out_ref, *, matmul_dtype):
    """One batch tile of the whole D_Net forward.

    x_ref   : (TB, d_model) f32           activations (batch on sublanes)
    wdm_ref : (d_model + d_inner, d_model) matmul_dtype; rows [0:d_model] =
              W_attn (folded w_vs @ w_fc), rows [d_model:] = w_2
    wdi_ref : (d_model + 8, d_inner)       matmul_dtype; rows [0:d_model] =
              w_1, row d_model = b_1, rest zero padding
    vec_ref : (8, d_model) f32             b_attn, ln1_g, ln1_b, b_2,
              wa*ln2_g (folded answer row), const row, 2 pad rows
    out_ref : (1, 1, TB) f32               sigmoid(logits), batch on lanes
    """
    d_model = x_ref.shape[-1]
    d_inner = wdi_ref.shape[-1]

    x = x_ref[...]                                   # (TB, d_model) f32
    wdm = wdm_ref[...]                               # matmul_dtype (constant)
    wdi = wdi_ref[...]                               # matmul_dtype (constant)
    vec = vec_ref[...]                               # f32

    w_attn = wdm[:d_model, :]                        # (d_model, d_model)
    w_2 = wdm[d_model:d_model + d_inner, :]          # (d_inner, d_model)
    w_1 = wdi[:d_model, :]                           # (d_model, d_inner)
    b_1 = wdi[d_model:d_model + 1, :].astype(jnp.float32)   # (1, d_inner)

    b_attn = vec[0:1, :]
    ln1_g = vec[1:2, :]
    ln1_b = vec[2:3, :]
    b_2 = vec[3:4, :]
    wag = vec[4:5, :]                                # w_ans_row * ln2_gamma
    c_ans = vec[5:6, 0:1]                            # sum(w_ans*ln2_beta)+b_ans

    def mm(a, w):
        # Weights are pre-cast to matmul_dtype; only the activation is cast.
        return jnp.dot(a.astype(matmul_dtype), w,
                       preferred_element_type=jnp.float32)

    # ---- MultiHeadAttention (seq_len == 1) + output fc, folded ------------
    o = mm(x, w_attn) + b_attn                       # == fc(V-projection(x))
    h = _layer_norm(o + x, ln1_g, ln1_b)             # residual + LayerNorm

    # ---- PositionwiseFeedForward (1x1 conv == per-token linear) -----------
    ff = jnp.maximum(mm(h, w_1) + b_1, 0.0)          # ReLU
    z = mm(ff, w_2) + b_2 + h                        # pre-LN2 residual sum

    # ---- LayerNorm2 with affine folded into the answer head ----------------
    mean = jnp.mean(z, axis=-1, keepdims=True)
    var = jnp.mean((z - mean) ** 2, axis=-1, keepdims=True)
    z_hat = (z - mean) * jax.lax.rsqrt(var + 1e-5)   # (TB, d_model)

    # ---- Answer head + sigmoid, lane-dense output ---------------------------
    # Contract d_model of both operands -> (1, TB): batch lives on lanes, so
    # the store is one dense row instead of a (TB, 1) column of masked stores.
    logit = jax.lax.dot_general(
        wag.astype(matmul_dtype), z_hat.astype(matmul_dtype),
        (((1,), (1,)), ((), ())),
        preferred_element_type=jnp.float32)          # (1, TB)
    out_ref[0] = jax.nn.sigmoid(logit + c_ans)


def pack_params(params, matmul_dtype=jnp.bfloat16):
    """Fold w_vs@w_fc and the LN2 affine, stack everything into 3 inputs."""
    d_model = params["ln1_g"].shape[-1]
    d_inner = params["w_1"].shape[1]

    # seq_len == 1  =>  attention output == V projection, so V-proj and the
    # MHA output fc compose into a single (d_model, d_model) matmul.
    w_attn = params["w_vs"] @ params["w_fc"]
    b_attn = params["b_vs"] @ params["w_fc"] + params["b_fc"]

    # Fold LN2's affine into the answer head:
    #   w_ans . (g2*z_hat + b2) + b_ans = (w_ans*g2) . z_hat + (w_ans.b2 + b_ans)
    wag = params["w_ans_row"] * params["ln2_g"]                       # (1, d_model)
    c_ans = (jnp.sum(params["w_ans_row"] * params["ln2_b"],
                     axis=-1, keepdims=True) + params["b_ans"])       # (1, 1)

    w_dm = jnp.concatenate([w_attn, params["w_2"]], axis=0).astype(matmul_dtype)
    w_di = jnp.concatenate(
        [params["w_1"], params["b_1"],
         jnp.zeros((7, d_inner), jnp.float32)], axis=0).astype(matmul_dtype)
    vecs = jnp.concatenate(
        [b_attn, params["ln1_g"], params["ln1_b"], params["b_2"],
         wag, jnp.broadcast_to(c_ans, (1, d_model)),
         jnp.zeros((2, d_model), jnp.float32)], axis=0).astype(jnp.float32)
    return w_dm, w_di, vecs


def d_net_forward(x, params, *, tile_b=4096, matmul_dtype=jnp.bfloat16,
                  num_tensorcores=1):
    """x: (B, d_model) f32 -> (B,) f32 (matches out.view(-1) + sigmoid).

    matmul_dtype=bf16 casts MXU operands only (bf16-native on v5e/v6e/v7x);
    LayerNorm, residuals and the sigmoid stay in f32.  Set num_tensorcores=2
    on v7x to allow megacore sharding of the batch axis.
    """
    B, d_model = x.shape
    # Layout/perf guard: the packed-slab row splits assume d_model % 8 == 0
    # (otherwise the in-kernel splits land mid sublane-tile).
    assert d_model % 8 == 0, "d_model must be a multiple of 8"

    w_dm, w_di, vecs = pack_params(params, matmul_dtype)

    # Tile selection (amortizes the ~0.35us/step pipeline overhead):
    #  * batch fits in one tile  -> one grid step, block == full array dims
    #    (no split on single-TC v5e/v6e, and never any padding),
    #  * v7x megacore (num_tensorcores >= 2) -> split only when each core gets
    #    >= 512 rows, tile rounded to a multiple of 128 (unmasked lane-dense
    #    output stores),
    #  * otherwise tile = tile_cap (multiple of 128); ragged last block is
    #    handled by Pallas boundary semantics (each output lane depends only
    #    on its own row, so OOB garbage only lands in lanes >= B, sliced off).
    tile_cap = max(128, (tile_b // 128) * 128)
    if B <= tile_cap:
        if num_tensorcores >= 2 and B >= 512 * num_tensorcores:
            tile = _round_up(pl.cdiv(B, num_tensorcores), 128)
        else:
            tile = B
    else:
        tile = tile_cap
    num_tiles = pl.cdiv(B, tile)

    kernel = functools.partial(d_net_kernel, matmul_dtype=matmul_dtype)

    out3d = pl.pallas_call(
        kernel,
        out_shape=jax.ShapeDtypeStruct((num_tiles, 1, tile), jnp.float32),
        grid=(num_tiles,),
        in_specs=[
            pl.BlockSpec((tile, d_model), lambda i: (i, 0)),
            pl.BlockSpec(w_dm.shape, lambda i: (0, 0)),
            pl.BlockSpec(w_di.shape, lambda i: (0, 0)),
            pl.BlockSpec(vecs.shape, lambda i: (0, 0)),
        ],
        out_specs=pl.BlockSpec((1, 1, tile), lambda i: (i, 0, 0)),
        compiler_params=pltpu.CompilerParams(
            dimension_semantics=("parallel",)),
    )(x, w_dm, w_di, vecs)

    return out3d.reshape(-1)[:B]


def _reference_forward(x, params):
    """Pure-JAX reference of the original (unfolded) math."""
    residual = x
    v = x @ params["w_vs"] + params["b_vs"]           # softmax over 1 key == 1
    o = v @ params["w_fc"] + params["b_fc"]
    h = _layer_norm(o + residual, params["ln1_g"], params["ln1_b"])
    ff = jnp.maximum(h @ params["w_1"] + params["b_1"], 0.0)
    ff = ff @ params["w_2"] + params["b_2"]
    h2 = _layer_norm(ff + h, params["ln2_g"], params["ln2_b"])
    logit = jnp.sum(h2 * params["w_ans_row"], axis=-1, keepdims=True) + params["b_ans"]
    return jax.nn.sigmoid(logit).reshape(-1)


def init_params(key, d_model, d_inner, n_head, d_k, d_v):
    ks = jax.random.split(key, 12)
    p = {}
    # MultiHeadAttention projections (q/k initialized for shape fidelity only;
    # with seq_len == 1 they provably cannot influence the output).
    p["w_qs_unused"] = jax.random.normal(ks[0], (d_model, n_head * d_k)) * (2.0 / (d_model + d_k)) ** 0.5
    p["w_ks_unused"] = jax.random.normal(ks[1], (d_model, n_head * d_k)) * (2.0 / (d_model + d_k)) ** 0.5
    p["w_vs"] = jax.random.normal(ks[2], (d_model, n_head * d_v)) * (2.0 / (d_model + d_v)) ** 0.5
    p["b_vs"] = jnp.zeros((1, n_head * d_v), jnp.float32)
    p["w_fc"] = jax.random.normal(ks[3], (n_head * d_v, d_model)) * (2.0 / (n_head * d_v + d_model)) ** 0.5
    p["b_fc"] = jax.random.normal(ks[4], (1, d_model)) * 0.02
    p["ln1_g"] = jnp.ones((1, d_model), jnp.float32)
    p["ln1_b"] = jnp.zeros((1, d_model), jnp.float32)
    # PositionwiseFeedForward (Conv1d k=1 weights stored as (in, out))
    p["w_1"] = jax.random.normal(ks[5], (d_model, d_inner)) * (1.0 / d_model) ** 0.5
    p["b_1"] = jax.random.normal(ks[6], (1, d_inner)) * 0.02
    p["w_2"] = jax.random.normal(ks[7], (d_inner, d_model)) * (1.0 / d_inner) ** 0.5
    p["b_2"] = jax.random.normal(ks[8], (1, d_model)) * 0.02
    p["ln2_g"] = jnp.ones((1, d_model), jnp.float32)
    p["ln2_b"] = jnp.zeros((1, d_model), jnp.float32)
    # Answer head: nn.Linear(d_model, 1); stored as a (1, d_model) row.
    p["w_ans_row"] = jax.random.normal(ks[9], (1, d_model)) * (1.0 / d_model) ** 0.5
    p["b_ans"] = jax.random.normal(ks[10], (1, 1)) * 0.02
    return {k: v.astype(jnp.float32) for k, v in p.items()}


if __name__ == "__main__":
    # Small shapes consistent with D_Net(channel, d_model, d_inner, n_head, d_k, d_v, dropout)
    channel = 4          # unused by forward()
    B = 16
    d_model, d_inner, n_head, d_k, d_v = 32, 64, 4, 8, 8
    dropout = 0.1        # identity at inference

    key = jax.random.PRNGKey(0)
    kx, kp = jax.random.split(key)
    x = jax.random.normal(kx, (B, d_model), jnp.float32)
    params = init_params(kp, d_model, d_inner, n_head, d_k, d_v)

    ref = _reference_forward(x, params)

    # Exact-path check: f32 MXU operands.
    out_f32 = jax.block_until_ready(d_net_forward(x, params, matmul_dtype=jnp.float32))
    assert out_f32.shape == (B,)
    assert bool(jnp.allclose(out_f32, ref, atol=1e-3, rtol=1e-3)), "f32 mismatch vs reference"

    # Default fast path: bf16 MXU operands, f32 accumulation / LN / sigmoid.
    out = jax.block_until_ready(d_net_forward(x, params))
    assert out.shape == (B,)
    assert bool(jnp.all((out >= 0.0) & (out <= 1.0)))
    assert bool(jnp.allclose(out, ref, atol=2e-2, rtol=2e-2)), "bf16 mismatch vs reference"

    print("KERNEL_OK")
</pallas_src>

<mosaic_0001>
module attributes {stable_mosaic.version = 11 : i64} {
  func.func @d_net_kernel(%arg0: i32, %arg1: memref<16x32xf32, #tpu.memory_space<vmem>>, %arg2: memref<96x32xf32, #tpu.memory_space<vmem>>, %arg3: memref<40x64xf32, #tpu.memory_space<vmem>>, %arg4: memref<8x32xf32, #tpu.memory_space<vmem>>, %arg5: memref<1x1x16xf32, #tpu.memory_space<vmem>>) attributes {dimension_semantics = [#tpu.dimension_semantics<parallel>], iteration_bounds = array<i64: 1>, scalar_prefetch = 0 : i64, scratch_operands = 0 : i64, tpu.core_type = #tpu.core_type<tc>, window_params = [{transform_indices = @transform_0, window_bounds = array<i64: 16, 32>}, {pipeline_mode = #tpu.pipeline_mode<synchronous>, transform_indices = @transform_1, window_bounds = array<i64: 96, 32>}, {pipeline_mode = #tpu.pipeline_mode<synchronous>, transform_indices = @transform_2, window_bounds = array<i64: 40, 64>}, {pipeline_mode = #tpu.pipeline_mode<synchronous>, transform_indices = @transform_3, window_bounds = array<i64: 8, 32>}, {transform_indices = @transform_4, window_bounds = array<i64: 1, 1, 16>}]} {
    %c0 = arith.constant 0 : index
    %c0_0 = arith.constant 0 : index
    %0 = vector.load %arg1[%c0, %c0_0] : memref<16x32xf32, #tpu.memory_space<vmem>>, vector<16x32xf32>
    %c0_1 = arith.constant 0 : index
    %c0_2 = arith.constant 0 : index
    %1 = vector.load %arg2[%c0_1, %c0_2] : memref<96x32xf32, #tpu.memory_space<vmem>>, vector<96x32xf32>
    %c0_3 = arith.constant 0 : index
    %c0_4 = arith.constant 0 : index
    %2 = vector.load %arg3[%c0_3, %c0_4] : memref<40x64xf32, #tpu.memory_space<vmem>>, vector<40x64xf32>
    %c0_5 = arith.constant 0 : index
    %c0_6 = arith.constant 0 : index
    %3 = vector.load %arg4[%c0_5, %c0_6] : memref<8x32xf32, #tpu.memory_space<vmem>>, vector<8x32xf32>
    %4 = vector.extract_strided_slice %1 {offsets = [0, 0], sizes = [32, 32], strides = [1, 1]} : vector<96x32xf32> to vector<32x32xf32>
    %5 = vector.extract_strided_slice %1 {offsets = [32, 0], sizes = [64, 32], strides = [1, 1]} : vector<96x32xf32> to vector<64x32xf32>
    %6 = vector.extract_strided_slice %2 {offsets = [0, 0], sizes = [32, 64], strides = [1, 1]} : vector<40x64xf32> to vector<32x64xf32>
    %7 = vector.extract_strided_slice %2 {offsets = [32, 0], sizes = [1, 64], strides = [1, 1]} : vector<40x64xf32> to vector<1x64xf32>
    %8 = vector.extract_strided_slice %3 {offsets = [0, 0], sizes = [1, 32], strides = [1, 1]} : vector<8x32xf32> to vector<1x32xf32>
    %9 = vector.extract_strided_slice %3 {offsets = [1, 0], sizes = [1, 32], strides = [1, 1]} : vector<8x32xf32> to vector<1x32xf32>
    %10 = vector.extract_strided_slice %3 {offsets = [2, 0], sizes = [1, 32], strides = [1, 1]} : vector<8x32xf32> to vector<1x32xf32>
    %11 = vector.extract_strided_slice %3 {offsets = [3, 0], sizes = [1, 32], strides = [1, 1]} : vector<8x32xf32> to vector<1x32xf32>
    %12 = vector.extract_strided_slice %3 {offsets = [4, 0], sizes = [1, 32], strides = [1, 1]} : vector<8x32xf32> to vector<1x32xf32>
    %13 = vector.extract_strided_slice %3 {offsets = [5, 0], sizes = [1, 1], strides = [1, 1]} : vector<8x32xf32> to vector<1x1xf32>
    %cst = arith.constant dense<0.000000e+00> : vector<16x32xf32>
    %14 = tpu.matmul %0, %4, %cst {dimension_numbers = #tpu.dot_dimension_numbers<[1], [0], [0], [1], [0, 0, 1, 1], [], []>} : vector<16x32xf32>, vector<32x32xf32>, vector<16x32xf32> -> vector<16x32xf32>
    %15 = vector.broadcast %8 : vector<1x32xf32> to vector<16x32xf32>
    %16 = arith.addf %14, %15 : vector<16x32xf32>
    %17 = arith.addf %16, %0 : vector<16x32xf32>
    %cst_7 = arith.constant dense<0.000000e+00> : vector<16xf32>
    %18 = vector.multi_reduction <add>, %17, %cst_7 [1] : vector<16x32xf32> to vector<16xf32>
    %19 = vector.shape_cast %18 : vector<16xf32> to vector<16x1xf32>
    %cst_8 = arith.constant 3.200000e+01 : f32
    %20 = vector.broadcast %cst_8 : f32 to vector<16x1xf32>
    %21 = arith.divf %19, %20 : vector<16x1xf32>
    %22 = vector.broadcast %21 : vector<16x1xf32> to vector<16x32xf32>
    %23 = arith.subf %17, %22 : vector<16x32xf32>
    %24 = arith.mulf %23, %23 : vector<16x32xf32>
    %cst_9 = arith.constant dense<0.000000e+00> : vector<16xf32>
    %25 = vector.multi_reduction <add>, %24, %cst_9 [1] : vector<16x32xf32> to vector<16xf32>
    %26 = vector.shape_cast %25 : vector<16xf32> to vector<16x1xf32>
    %cst_10 = arith.constant 3.200000e+01 : f32
    %27 = vector.broadcast %cst_10 : f32 to vector<16x1xf32>
    %28 = arith.divf %26, %27 : vector<16x1xf32>
    %29 = vector.broadcast %21 : vector<16x1xf32> to vector<16x32xf32>
    %30 = arith.subf %17, %29 : vector<16x32xf32>
    %cst_11 = arith.constant 9.99999974E-6 : f32
    %31 = vector.broadcast %cst_11 : f32 to vector<16x1xf32>
    %32 = arith.addf %28, %31 : vector<16x1xf32>
    %33 = math.rsqrt %32 : vector<16x1xf32>
    %34 = vector.broadcast %33 : vector<16x1xf32> to vector<16x32xf32>
    %35 = arith.mulf %30, %34 : vector<16x32xf32>
    %36 = vector.broadcast %9 : vector<1x32xf32> to vector<16x32xf32>
    %37 = arith.mulf %35, %36 : vector<16x32xf32>
    %38 = vector.broadcast %10 : vector<1x32xf32> to vector<16x32xf32>
    %39 = arith.addf %37, %38 : vector<16x32xf32>
    %cst_12 = arith.constant dense<0.000000e+00> : vector<16x64xf32>
    %40 = tpu.matmul %39, %6, %cst_12 {dimension_numbers = #tpu.dot_dimension_numbers<[1], [0], [0], [1], [0, 0, 1, 1], [], []>} : vector<16x32xf32>, vector<32x64xf32>, vector<16x64xf32> -> vector<16x64xf32>
    %41 = vector.broadcast %7 : vector<1x64xf32> to vector<16x64xf32>
    %42 = arith.addf %40, %41 : vector<16x64xf32>
    %cst_13 = arith.constant 0.000000e+00 : f32
    %43 = vector.broadcast %cst_13 : f32 to vector<16x64xf32>
    %44 = arith.maximumf %42, %43 : vector<16x64xf32>
    %cst_14 = arith.constant dense<0.000000e+00> : vector<16x32xf32>
    %45 = tpu.matmul %44, %5, %cst_14 {dimension_numbers = #tpu.dot_dimension_numbers<[1], [0], [0], [1], [0, 0, 1, 1], [], []>} : vector<16x64xf32>, vector<64x32xf32>, vector<16x32xf32> -> vector<16x32xf32>
    %46 = vector.broadcast %11 : vector<1x32xf32> to vector<16x32xf32>
    %47 = arith.addf %45, %46 : vector<16x32xf32>
    %48 = arith.addf %47, %39 : vector<16x32xf32>
    %cst_15 = arith.constant dense<0.000000e+00> : vector<16xf32>
    %49 = vector.multi_reduction <add>, %48, %cst_15 [1] : vector<16x32xf32> to vector<16xf32>
    %50 = vector.shape_cast %49 : vector<16xf32> to vector<16x1xf32>
    %cst_16 = arith.constant 3.200000e+01 : f32
    %51 = vector.broadcast %cst_16 : f32 to vector<16x1xf32>
    %52 = arith.divf %50, %51 : vector<16x1xf32>
    %53 = vector.broadcast %52 : vector<16x1xf32> to vector<16x32xf32>
    %54 = arith.subf %48, %53 : vector<16x32xf32>
    %55 = arith.mulf %54, %54 : vector<16x32xf32>
    %cst_17 = arith.constant dense<0.000000e+00> : vector<16xf32>
    %56 = vector.multi_reduction <add>, %55, %cst_17 [1] : vector<16x32xf32> to vector<16xf32>
    %57 = vector.shape_cast %56 : vector<16xf32> to vector<16x1xf32>
    %cst_18 = arith.constant 3.200000e+01 : f32
    %58 = vector.broadcast %cst_18 : f32 to vector<16x1xf32>
    %59 = arith.divf %57, %58 : vector<16x1xf32>
    %60 = vector.broadcast %52 : vector<16x1xf32> to vector<16x32xf32>
    %61 = arith.subf %48, %60 : vector<16x32xf32>
    %cst_19 = arith.constant 9.99999974E-6 : f32
    %62 = vector.broadcast %cst_19 : f32 to vector<16x1xf32>
    %63 = arith.addf %59, %62 : vector<16x1xf32>
    %64 = math.rsqrt %63 : vector<16x1xf32>
    %65 = vector.broadcast %64 : vector<16x1xf32> to vector<16x32xf32>
    %66 = arith.mulf %61, %65 : vector<16x32xf32>
    %cst_20 = arith.constant dense<0.000000e+00> : vector<1x16xf32>
    %67 = tpu.matmul %12, %66, %cst_20 {dimension_numbers = #tpu.dot_dimension_numbers<[1], [1], [0], [0], [0, 0, 1, 0], [], []>} : vector<1x32xf32>, vector<16x32xf32>, vector<1x16xf32> -> vector<1x16xf32>
    %68 = vector.broadcast %13 : vector<1x1xf32> to vector<1x16xf32>
    %69 = arith.addf %67, %68 : vector<1x16xf32>
    %70 = arith.negf %69 : vector<1x16xf32>
    %71 = math.exp %70 : vector<1x16xf32>
    %cst_21 = arith.constant 1.000000e+00 : f32
    %72 = vector.broadcast %cst_21 : f32 to vector<1x16xf32>
    %73 = arith.addf %72, %71 : vector<1x16xf32>
    %74 = arith.divf %72, %73 : vector<1x16xf32>
    %c0_22 = arith.constant 0 : index
    %c0_23 = arith.constant 0 : index
    %c0_24 = arith.constant 0 : index
    %75 = vector.load %arg5[%c0_22, %c0_23, %c0_24] : memref<1x1x16xf32, #tpu.memory_space<vmem>>, vector<1x1x16xf32>
    %76 = vector.shape_cast %75 : vector<1x1x16xf32> to vector<1x16xf32>
    %77 = vector.shape_cast %74 : vector<1x16xf32> to vector<1x1x16xf32>
    tpu.vector_store %arg5[%c0_22, %c0_23, %c0_24], %77 {strides = array<i32>} : memref<1x1x16xf32, #tpu.memory_space<vmem>>, vector<1x1x16xf32>,
    return
  }
  func.func @transform_0(%arg0: i32) -> (i32, i32) {
    %c0_i32 = arith.constant 0 : i32
    %c0_i32_0 = arith.constant 0 : i32
    return %arg0, %c0_i32 : i32, i32
  }
  func.func @transform_1(%arg0: i32) -> (i32, i32) {
    %c0_i32 = arith.constant 0 : i32
    %c0_i32_0 = arith.constant 0 : i32
    %c0_i32_1 = arith.constant 0 : i32
    return %c0_i32, %c0_i32_0 : i32, i32
  }
  func.func @transform_2(%arg0: i32) -> (i32, i32) {
    %c0_i32 = arith.constant 0 : i32
    %c0_i32_0 = arith.constant 0 : i32
    %c0_i32_1 = arith.constant 0 : i32
    return %c0_i32, %c0_i32_0 : i32, i32
  }
  func.func @transform_3(%arg0: i32) -> (i32, i32) {
    %c0_i32 = arith.constant 0 : i32
    %c0_i32_0 = arith.constant 0 : i32
    %c0_i32_1 = arith.constant 0 : i32
    return %c0_i32, %c0_i32_0 : i32, i32
  }
  func.func @transform_4(%arg0: i32) -> (i32, i32, i32) {
    %c0_i32 = arith.constant 0 : i32
    %c0_i32_0 = arith.constant 0 : i32
    %c0_i32_1 = arith.constant 0 : i32
    return %arg0, %c0_i32, %c0_i32_0 : i32, i32, i32
  }
}

</mosaic_0001>

<bundles_post_ra>
// kernel: tpu_custom_call.1
= control target key start
LH: loop header
LB: loop body
LE: loop exit
PB: predicated region body
PF: predicated region fallthrough
CT: control target
= control target key end

     0   :  { %vm42_vm0 = vcmask 261120   ;;  %s769_s0 = inlined_call_operand.vmem [shape: f32[16,32], index: 0, kind: input, shape index: {}]   ;;  %s770_s1 = inlined_call_operand.vmem [shape: f32[96,32], index: 1, kind: input, shape index: {}]   ;;  %s771_s2 = inlined_call_operand.vmem [shape: f32[40,64], index: 2, kind: input, shape index: {}]   ;;  %s772_s3 = inlined_call_operand.vmem [shape: f32[8,32], index: 3, kind: input, shape index: {}]   ;;  %s773_s4 = inlined_call_operand.hbm [shape: f32[1,1,16], index: 4, kind: output, shape index: {}]  }
   0x1   :  { %v20_v0 = vld [vmem:[%s770_s1] sm:$0xff]  ;;  %v21_v1 = vld [vmem:[%s770_s1 + $0x8] sm:$0xff]  ;;  %v22_v2 = vld [vmem:[%s770_s1 + $0x10] sm:$0xff] }
   0x2   :  { %v556_v3 = vpack.c.bf16 %v21_v1, %v20_v0  ;;  %v23_v4 = vld [vmem:[%s770_s1 + $0x18] sm:$0xff]  ;;  %v18_v5 = vld [vmem:[%s769_s0] sm:$0xff] }
   0x3   :  { %v560_v6 = vpack.c.bf16 %v23_v4, %v22_v2  ;;  %516 = vmatprep.mubr.msk.f32.mxu0 %vm42_vm0, %v18_v5 }
   0x4   :  { %9 = vsyncpa [#allocation3], 0  ;;  %557 = vmatprep.subr.bf16.mxu0 %v556_v3  ;;  %v19_v7 = vld [vmem:[%s769_s0 + $0x8] sm:$0xff]  ;;  %v38_v8 = vlaneseq  ;;  %v690_v11 = vld [vmem:[%s772_s3] sm:$0xff]  ;;  %vm256_vm1 = vcmask 523264   ;;  %vm635_vm2 = vmmov 0  }
   0x5   :  { %559 = vmatpush3.bf16.msra.mxu0 %v556_v3  ;;  %v32_v31 = vld [vmem:[%s771_s2] sm:$0xff]  ;;  %v33_v32 = vld [vmem:[%s771_s2 + $0x8] sm:$0xff]  ;;  %v34_v33 = vld [vmem:[%s771_s2 + $0x10] sm:$0xff]  ;;  %vm457_vm4 = vcmask 122880  }
   0x6   :  { %561 = vmatprep.subr.bf16.mxu0 %v560_v6  ;;  %v684_v9 = vshrl.u32 %v38_v8, 7  ;;  %v564_v34 = vpack.c.bf16 %v33_v32, %v32_v31  ;;  %v35_v35 = vld [vmem:[%s771_s2 + $0x18] sm:$0xff]  ;;  %v24_v37 = vld [vmem:[%s770_s1 + $0x20] sm:$0xff]  ;;  %v25_v38 = vld [vmem:[%s770_s1 + $0x28] sm:$0xff]  ;;  %v634_v32 = vmov 0.0|0.0  }
   0x7   :  { %v568_v36 = vpack.c.bf16 %v35_v35, %v34_v33  ;;  %v26_v39 = vld [vmem:[%s770_s1 + $0x30] sm:$0xff]  ;;  %v572_v40 = vpack.c.bf16 %v25_v38, %v24_v37  ;;  %v27_v41 = vld [vmem:[%s770_s1 + $0x38] sm:$0xff]  ;;  %v28_v43 = vld [vmem:[%s770_s1 + $0x40] sm:$0xff]  ;;  %v636_v33 = vmov 0.0  }
   0x8   :  { %v40_v10 = vsub.s32 0, %v684_v9  ;;  %565 = vmatprep.subr.bf16.mxu1 %v564_v34  ;;  %v576_v42 = vpack.c.bf16 %v27_v41, %v26_v39  ;;  %v29_v44 = vld [vmem:[%s770_s1 + $0x48] sm:$0xff]  ;;  %v155_v52 = vsub.s32 1, %v684_v9  ;;  %v161_v53 = vsub.s32 2, %v684_v9  ;;  %v30_v0 = vld [vmem:[%s770_s1 + $0x50] sm:$0xff]  ;;  %v31_v1 = vld [vmem:[%s770_s1 + $0x58] sm:$0xff] }
   0x9   :  { %563 = vmatpush3.bf16.msra.mxu0 %v560_v6  ;;  %567 = vmatpush3.bf16.msra.mxu1 %v564_v34  ;;  %v580_v45 = vpack.c.bf16 %v29_v44, %v28_v43  ;;  %v584_v2 = vpack.c.bf16 %v31_v1, %v30_v0  ;;  %v36_v3 = vld [vmem:[%s771_s2 + $0x20] sm:$0xff]  ;;  %v637_v34 = vmov 0   ;;  %vm590_vm3 = vmpackc.low %vm42_vm0, %vm42_vm0  ;;  %s638_s1 = smov [#allocation2]  }
   0xa   :  { %v41_v12 = vrot.slane %v690_v11, %v40_v10  ;;  %569 = vmatprep.subr.bf16.mxu1 %v568_v36  ;;  %573 = vmatprep.subr.bf16.mxu0 %v572_v40  ;;  %v156_v54 = vrot.slane %v690_v11, %v155_v52  ;;  %v162_v57 = vrot.slane %v690_v11, %v161_v53  ;;  %s465_s2 = sshll.u32 %s638_s1, 4  ;;  %s466_s2 = int_to_ptr.vmem [resolvable:$true] %s465_s2 }
   0xb   :  { %v168_v4 = vrot.slane %v36_v3, %v40_v10  ;;  %597 = vset.pattern.permute.xlu0 %v637_v34  ;;  %s610_s27 = scalar_lea.vmem %s466_s2, 16  ;;  %s614_s28 = scalar_lea.vmem %s466_s2, 32 }
   0xc   :  { %517 = vmatmul.mubr.msk.f32.vlgmr.msra.gmra.mrb[0].mxu0 %vm42_vm0, %v19_v7  ;;  %p611_p0 = scmp.ne.s32.totalorder %s466_s2, %s610_s27  ;;  %p615_p1 = scmp.lt.s32.totalorder %s466_s2, %s466_s2 }
   0xd   :  { %571 = vmatpush3.bf16.msra.mxu1 %v568_v36  ;;  %575 = vmatpush3.bf16.msra.mxu0 %v572_v40  ;;  %p616_p2 = scmp.lt.s32.totalorder %s614_s28, %s610_s27 }
   0xe   :  { %577 = vmatprep.subr.bf16.mxu0 %v576_v42  ;;  %588 = vmatprep.subr.bf16.mxu1 %v634_v32 }
   0xf   :  { %p617_p3 = por %p616_p2, %p615_p1 }
  0x11   :  { %579 = vmatpush3.bf16.msra.mxu0 %v576_v42  ;;  %p618_p4 = pnand %p617_p3, %p611_p0 }
  0x12   :  { %581 = vmatprep.subr.bf16.mxu0 %v580_v45 }
  0x15   :  { %583 = vmatpush3.bf16.msra.mxu0 %v580_v45 }
  0x16   :  { %585 = vmatprep.subr.bf16.mxu0 %v584_v2 }
  0x19   :  { %587 = vmatpush3.bf16.msra.mxu0 %v584_v2 }
  0xdf   :  { %v518_v13 = vpop.f32.mrb[0].mxu0 }
  0xe0   :  { %v115_v14 = vpop.f32.mrb[1].mxu0  ;;  %v121_v15 = vadd.f32 %v518_v13, %v41_v12 }
  0xe1   :  { %v116_v16 = vadd.f32 %v115_v14, %v41_v12  ;;  %v254_v14 = vsub.s32 3, %v684_v9 }
  0xe2   :  { %v125_v19 = vadd.f32 %v121_v15, %v19_v7 }
  0xe3   :  { %v124_v17 = vadd.f32 %v116_v16, %v18_v5  ;;  %v255_v15 = vrot.slane %v690_v11, %v254_v14 }
  0xe4   :  { %v129_v20 = vsel %vm42_vm0, %v125_v19, 0.0 }
  0xe5   :  { %v126_v18 = vsel %vm42_vm0, %v124_v17, 0.0 }
  0xe6   :  { %127 = vadd.xlane.f32.xlu0 %v126_v18 }
  0xea   :  { %130 = vadd.xlane.f32.xlu0 %v129_v20 }
 0x173   :  { %v128_v21 = vpop.xlane.xlu0 %127 }
 0x174   :  { %v133_v22 = vmul.f32 0.03125, %v128_v21 }
 0x176   :  { %v135_v23 = vsub.f32 %v124_v17, %v133_v22 }
 0x177   :  { %v131_v24 = vpop.xlane.xlu0 %130 }
 0x178   :  { %v134_v25 = vmul.f32 0.03125, %v131_v24  ;;  %v137_v26 = vmul.f32 %v135_v23, %v135_v23 }
 0x17a   :  { %v136_v27 = vsub.f32 %v125_v19, %v134_v25  ;;  %v139_v28 = vsel %vm42_vm0, %v137_v26, 0.0 }
 0x17b   :  { %140 = vadd.xlane.f32.xlu1 %v139_v28 }
 0x17c   :  { %v138_v29 = vmul.f32 %v136_v27, %v136_v27 }
 0x17e   :  { %v142_v30 = vsel %vm42_vm0, %v138_v29, 0.0 }
 0x17f   :  { %143 = vadd.xlane.f32.xlu1 %v142_v30 }
 0x208   :  { %v141_v46 = vpop.xlane.xlu1 %140 }
 0x209   :  { %v145_v47 = vmul.f32 0.03125, %v141_v46  ;;  %v370_v46 = vrot.slane %v690_v11, 4 }
 0x20b   :  { %v147_v48 = vadd.f32 1e-05, %v145_v47 }
 0x20c   :  { %v144_v49 = vpop.xlane.xlu1 %143 }
 0x20d   :  { %598 = vrsqrt.f32 %v147_v48  ;;  %v146_v50 = vmul.f32 0.03125, %v144_v49 }
 0x20f   :  { %v148_v51 = vadd.f32 1e-05, %v146_v50 }
 0x211   :  { %600 = vrsqrt.f32 %v148_v51 }
 0x217   :  { %v599_v55 = vpop.eup %598 }
 0x218   :  { %v151_v56 = vmul.f32 %v599_v55, %v135_v23 }
 0x21a   :  { %v157_v58 = vmul.f32 %v156_v54, %v151_v56 }
 0x21b   :  { %v601_v59 = vpop.eup %600 }
 0x21c   :  { %v152_v60 = vmul.f32 %v601_v59, %v136_v27  ;;  %v163_v61 = vadd.f32 %v162_v57, %v157_v58 }
 0x21e   :  { %v158_v62 = vmul.f32 %v156_v54, %v152_v60  ;;  %527 = vmatprep.mubr.msk.f32.mxu1 %vm42_vm0, %v163_v61 }
 0x220   :  { %v164_v63 = vadd.f32 %v162_v57, %v158_v62 }
 0x222   :  { %528 = vmatmul.mubr.msk.f32.vlgmr.msra.gmra.mrb[0].mxu1 %vm42_vm0, %v164_v63 }
 0x223   :  { %553 = vmatprep.mubr.msk.f32.mxu1 %vm635_vm2, %v636_v33 }
 0x2f5   :  { %v529_v5 = vpop.f32.mrb[0].mxu1 }
 0x2f6   :  { %v247_v6 = vadd.f32 %v529_v5, %v168_v4  ;;  %v241_v7 = vpop.f32.mrb[1].mxu1 }
 0x2f7   :  { %v242_v8 = vadd.f32 %v241_v7, %v168_v4 }
 0x2f8   :  { %v251_v13 = vmax.f32 %v247_v6, 0.0 }
 0x2f9   :  { %v250_v12 = vmax.f32 %v242_v8, 0.0 }
 0x2fb   :  { %546 = vmatprep.mubr.msk.f32.mxu0 %vm256_vm1, %v250_v12 }
 0x2fc   :  { %547 = vmatmul.mubr.msk.f32.vlgmr.msra.gmra.mrb[2].mxu0 %vm256_vm1, %v251_v13 }
 0x3cf   :  { %v548_v16 = vpop.f32.mrb[2].mxu0 }
 0x3d0   :  { %v335_v17 = vadd.f32 %v548_v16, %v255_v15  ;;  %v329_v18 = vpop.f32.mrb[3].mxu0 }
 0x3d1   :  { %v330_v19 = vadd.f32 %v329_v18, %v255_v15 }
 0x3d2   :  { %v339_v20 = vadd.f32 %v335_v17, %v164_v63 }
 0x3d3   :  { %v338_v21 = vadd.f32 %v330_v19, %v163_v61 }
 0x3d4   :  { %v343_v10 = vsel %vm42_vm0, %v339_v20, 0.0 }
 0x3d5   :  { %344 = vadd.xlane.f32.xlu1 %v343_v10  ;;  %v340_v22 = vsel %vm42_vm0, %v338_v21, 0.0 }
 0x3d6   :  { %341 = vadd.xlane.f32.xlu0 %v340_v22 }
 0x462   :  { %v345_v23 = vpop.xlane.xlu1 %344 }
 0x463   :  { %v347_v24 = vmul.f32 0.03125, %v345_v23  ;;  %v342_v25 = vpop.xlane.xlu0 %341 }
 0x464   :  { %v346_v26 = vmul.f32 0.03125, %v342_v25 }
 0x465   :  { %v349_v27 = vsub.f32 %v339_v20, %v347_v24 }
 0x466   :  { %v348_v9 = vsub.f32 %v338_v21, %v346_v26 }
 0x467   :  { %v351_v28 = vmul.f32 %v349_v27, %v349_v27 }
 0x468   :  { %v350_v29 = vmul.f32 %v348_v9, %v348_v9 }
 0x469   :  { %v355_v30 = vsel %vm42_vm0, %v351_v28, 0.0 }
 0x46a   :  { %356 = vadd.xlane.f32.xlu1 %v355_v30  ;;  %v352_v31 = vsel %vm42_vm0, %v350_v29, 0.0 }
 0x46b   :  { %353 = vadd.xlane.f32.xlu0 %v352_v31 }
 0x481   :  { %368 = vperm.xlu0 %597, %v690_v11  }
 0x4f7   :  { %v357_v35 = vpop.xlane.xlu1 %356 }
 0x4f8   :  { %v359_v36 = vmul.f32 0.03125, %v357_v35  ;;  %v354_v37 = vpop.xlane.xlu0 %353 }
 0x4f9   :  { %v358_v38 = vmul.f32 0.03125, %v354_v37 }
 0x4fa   :  { %v361_v39 = vadd.f32 1e-05, %v359_v36 }
 0x4fb   :  { %v360_v40 = vadd.f32 1e-05, %v358_v38 }
 0x4fc   :  { %602 = vrsqrt.f32 %v361_v39 }
 0x4fd   :  { %604 = vrsqrt.f32 %v360_v40 }
 0x500   :  { %v369_v47 = vpop.permute.xlu0 %368 }
 0x501   :  { %v371_v48 = vrot.slane %v369_v47, 5 }
 0x506   :  { %v603_v41 = vpop.eup %602 }
 0x507   :  { %v605_v42 = vpop.eup %604  ;;  %v365_v43 = vmul.f32 %v603_v41, %v349_v27 }
 0x508   :  { %v364_v44 = vmul.f32 %v605_v42, %v348_v9 }
 0x50a   :  { %v589_v45 = vpack.c.bf16 %v365_v43, %v364_v44 }
 0x50c   :  { %591 = vmatpush3.bf16.xpose.msk.msra.mxu1 %vm590_vm3, %v589_v45 }
 0x513   :  { %554 = vmatmul.mubr.msk.f32.vlgmr.msra.gmra.mrb[2].mxu1 %vm42_vm0, %v370_v46 }
 0x5e6   :  { %v447_v49 = vpop.f32.mrb[2].mxu1 }
 0x5e7   :  { %v448_v50 = vadd.f32 %v447_v49, %v371_v48  ;;  %v555_v51 = vpop.f32.mrb[3].mxu1 }
 0x5e9   :  { %v482_v52 = vmul.f32 -1.442695, %v448_v50 }
 0x5eb   :  { %606 = vpow2.f32 %v482_v52 }
 0x5f5   :  { %v607_v53 = vpop.eup %606 }
 0x5f6   :  { %v454_v54 = vadd.f32 1.0, %v607_v53 }
 0x5f8   :  { %608 = vrcp.f32 %v454_v54 }
 0x602   :  { %v609_v55 = vpop.eup %608 }
 0x603   :  { %458 = vst.msk [vmem:[#allocation2] sm:$0x1] %vm457_vm4, %v609_v55 }
 0x604   :  { %621 = shalt.err (!%p618_p4)
}
 0x605   :  { %s622_s29 = scalar_lea.hbm %s773_s4, 16 }
 0x606   :  { %p623_p5 = scmp.ne.s32.totalorder %s773_s4, %s622_s29  ;;  %p626_p6 = scmp.lt.u32.totalorder %s622_s29, %s773_s4 }
 0x608   :  { %p628_p7 = pnand %p626_p6, %p623_p5 }
 0x60a   :  { %631 = shalt.err (!%p628_p7)
}
 0x60b   :  { %468 = dma.vmem_to_hbm [thread:$0]  %s466_s2, 16, %s773_s4, [#allocation3]  }
 0x60c   :  { %632 = dma.done.wait [#allocation3], 16  }
 0x60d   :  { %633 = vsyncadd [#allocation3], 4294967280 }
 0x60e   :  { %472 = vsyncpa [#allocation3], 1 }

</bundles_post_ra>
